<compile_context>
chip_gen: v5e
topology: v5e:2x2
jax: 0.10.0
libtpu: 0.0.40
codegen_flags: <defaults>
</compile_context>

<pallas_src>
import functools
import math

import jax
import jax.numpy as jnp
from jax.experimental import pallas as pl
from jax.experimental.pallas import tpu as pltpu


# MXU operand / activation transport dtype.  Accumulation is always f32 via
# preferred_element_type; set both to jnp.float32 to recover fp32 numerics.
_MXU_DTYPE = jnp.bfloat16
_ACT_DTYPE = jnp.bfloat16


# ----------------------------------------------------------------------------
# In-kernel helpers
# ----------------------------------------------------------------------------
def _dot(a, b):
    """(M, K) @ (K, N) on the MXU with f32 accumulation."""
    return jnp.dot(a.astype(_MXU_DTYPE), b.astype(_MXU_DTYPE),
                   preferred_element_type=jnp.float32)


def _dot_nt(a, b):
    """(M, K) x (N, K) -> (M, N): contract the last dims (no explicit transpose)."""
    return jax.lax.dot_general(
        a.astype(_MXU_DTYPE), b.astype(_MXU_DTYPE),
        (((1,), (1,)), ((), ())), preferred_element_type=jnp.float32)


def _layernorm(x, g, b, eps):
    mu = jnp.mean(x, axis=-1, keepdims=True)
    d = x - mu
    var = jnp.mean(d * d, axis=-1, keepdims=True)
    return d * jax.lax.rsqrt(var + eps) * g + b


def _round_up(x, m):
    return ((x + m - 1) // m) * m


def _row_tile(n, target=512):
    """Row tile (multiple of 8) and padded row count — never degenerate to n."""
    if n <= target:
        t = _round_up(n, 8)
        return t, t
    for t in range(target, 7, -8):
        if n % t == 0:
            return t, n
    return target, _round_up(n, target)


def _seq_tile(L, target=256):
    """Query-tile for the attention grid (multiple of 8 dividing L, or full L)."""
    if L <= target:
        return L
    for t in range(target, 7, -8):
        if L % t == 0:
            return t
    return L


def _col_tile(vp):
    for t in (512, 256, 128):
        if vp % t == 0:
            return t
    return vp


def _vmem_limit(est_bytes, floor=32 << 20, cap=64 << 20):
    """Explicit scoped-VMEM budget (beats the 16/32 MiB defaults on v5e/v6e,
    capped at 64 MiB so it is always <= physical VMEM, incl. v7x)."""
    return int(min(max(2 * est_bytes, floor), cap))


# ----------------------------------------------------------------------------
# Pallas kernels
# ----------------------------------------------------------------------------
def _attention_block_kernel(xq_ref, xkv_ref, bias_ref,
                            wq_ref, bq_ref, wkv_ref, bkv_ref,
                            wo_ref, bo_ref, g_ref, bln_ref,
                            o_ref, attn_ref, *, num_heads, causal, eps):
    """Fused: QKV proj -> MHA -> output proj -> residual add -> LayerNorm.

    xq_ref: (1, tq, D) bf16 query tile, xkv_ref: (1, S, D) bf16; bf16 weights
    resident in VMEM (constant index maps).  Per-head outputs are packed into
    the lane-dense attn_ref scratch slab.
    """
    xq = xq_ref[0]                           # (tq, D) bf16
    xkv = xkv_ref[0]                         # (S, D) bf16
    tq, D = xq.shape
    S = xkv.shape[0]
    dh = D // num_heads

    # Projections (K|V fused into one matmul).  1/sqrt(dh) is pre-folded into wq/bq.
    q = _dot(xq, wq_ref[...]) + bq_ref[...]          # (tq, D)  f32
    kv = _dot(xkv, wkv_ref[...]) + bkv_ref[...]      # (S, 2D)  f32
    k = kv[:, :D]
    v = kv[:, D:]

    # Additive attention bias: per-key vector (1, S) or full (tq, S); causal
    # component built in-kernel with iota (never DMA'd from HBM).
    bias = bias_ref[0].astype(jnp.float32)
    if causal:
        q0 = pl.program_id(1) * tq
        row = q0 + jax.lax.broadcasted_iota(jnp.int32, (tq, S), 0)
        col = jax.lax.broadcasted_iota(jnp.int32, (tq, S), 1)
        bias = bias + jnp.where(col > row, -1e9, 0.0)

    # TODO(synk): for very long S add a kv-tile / online-softmax inner loop
    # (flash style) so the per-head (tq, S) score slab is bounded on v7x 64 MiB.
    for h in range(num_heads):
        lo = h * dh
        s = _dot_nt(q[:, lo:lo + dh], k[:, lo:lo + dh]) + bias        # (tq, S)
        m = jnp.max(s, axis=-1, keepdims=True)
        p = jnp.exp(s - m)
        p = p * pl.reciprocal(jnp.sum(p, axis=-1, keepdims=True), approx=True)
        attn_ref[:, lo:lo + dh] = _dot(p, v[:, lo:lo + dh]).astype(attn_ref.dtype)

    # Output projection + residual + LayerNorm epilogue (f32 math, bf16 store).
    y = _dot(attn_ref[...], wo_ref[...]) + bo_ref[...] + xq.astype(jnp.float32)
    o_ref[0] = _layernorm(y, g_ref[...], bln_ref[...], eps).astype(o_ref.dtype)


def _ffn_block_kernel(x_ref, w1_ref, b1_ref, w2_ref, b2_ref, g_ref, bln_ref,
                      o_ref, *, eps, activation):
    """Fused: W1 -> act -> W2 -> residual add -> LayerNorm, tiled over rows."""
    x = x_ref[...]                                   # (tm, D) bf16
    h = _dot(x, w1_ref[...]) + b1_ref[...]
    if activation == "relu":
        h = jnp.maximum(h, 0.0)
    else:
        h = jax.nn.gelu(h)
    y = _dot(h, w2_ref[...]) + b2_ref[...] + x.astype(jnp.float32)
    o_ref[...] = _layernorm(y, g_ref[...], bln_ref[...], eps).astype(o_ref.dtype)


def _final_ln_proj_kernel(x_ref, g_ref, b_ref, w_ref, pb_ref, o_ref, xn_ref,
                          *, eps):
    """Fused final LayerNorm + vocab projection.  LN is computed once per row
    tile (inner vocab axis j == 0) into VMEM scratch and reused for all j."""
    @pl.when(pl.program_id(1) == 0)
    def _():
        xn = _layernorm(x_ref[...].astype(jnp.float32), g_ref[...], b_ref[...], eps)
        xn_ref[...] = xn.astype(xn_ref.dtype)

    o_ref[...] = _dot(xn_ref[...], w_ref[...]) + pb_ref[...]


# ----------------------------------------------------------------------------
# Pallas wrappers
# ----------------------------------------------------------------------------
def attention_block(x_q, x_kv, p, ln_g, ln_b, *, num_heads, causal,
                    key_bias=None, full_bias=None, eps=1e-5):
    """x_q: (B, L, D), x_kv: (B, S, D).  Weights in `p` are bf16 (prepare_params).

    key_bias: optional (B, S) additive bias per key (broadcast over queries).
    full_bias: optional (B, L, S) additive mask (disables in-kernel causal).
    """
    B, L, D = x_q.shape
    S = x_kv.shape[1]
    tq = _seq_tile(L)

    x_q = x_q.astype(_ACT_DTYPE)
    x_kv = x_kv.astype(_ACT_DTYPE)

    if full_bias is not None:
        bias = full_bias.astype(jnp.float32)                       # (B, L, S)
        bias_spec = pl.BlockSpec((1, tq, S), lambda b, q: (b, q, 0))
        bias_rows = tq
    else:
        if key_bias is None:
            key_bias = jnp.zeros((B, S), jnp.float32)
        bias = key_bias.astype(jnp.float32).reshape(B, 1, S)       # (B, 1, S)
        bias_spec = pl.BlockSpec((1, 1, S), lambda b, q: (b, 0, 0))
        bias_rows = 1

    kernel = functools.partial(_attention_block_kernel, num_heads=num_heads,
                               causal=causal, eps=eps)

    # VMEM estimate: bf16 weights (double-buffered by the pipeline even though
    # their index map is constant), double-buffered activation tiles, f32
    # intermediates (q, kv, scores) and the bf16 attention scratch slab.
    # TODO(synk): single-buffer the constant-index weight blocks (pl.Buffered(1))
    # once pipeline_mode on pallas_call inputs is validated on the target jax.
    est = (2 * 2 * 4 * D * D
           + 2 * 2 * (tq * D + S * D + tq * D)
           + 2 * 4 * bias_rows * S
           + 4 * (tq * D + 2 * S * D + tq * S)
           + 2 * tq * D)

    flops = 8 * B * L * D * D + 4 * B * L * S * D
    bytes_acc = (2 * B * L * D * 2 + 2 * B * S * D + 2 * 4 * D * D
                 + 4 * B * bias_rows * S)

    return pl.pallas_call(
        kernel,
        out_shape=jax.ShapeDtypeStruct((B, L, D), _ACT_DTYPE),
        grid=(B, L // tq),
        in_specs=[
            pl.BlockSpec((1, tq, D), lambda b, q: (b, q, 0)),   # x_q tile
            pl.BlockSpec((1, S, D), lambda b, q: (b, 0, 0)),    # x_kv (per batch)
            bias_spec,                                          # attention bias
            pl.BlockSpec((D, D), lambda b, q: (0, 0)),          # wq (scale folded)
            pl.BlockSpec((1, D), lambda b, q: (0, 0)),          # bq
            pl.BlockSpec((D, 2 * D), lambda b, q: (0, 0)),      # wkv (fused K|V)
            pl.BlockSpec((1, 2 * D), lambda b, q: (0, 0)),      # bkv
            pl.BlockSpec((D, D), lambda b, q: (0, 0)),          # wo
            pl.BlockSpec((1, D), lambda b, q: (0, 0)),          # bo
            pl.BlockSpec((1, D), lambda b, q: (0, 0)),          # LN gamma
            pl.BlockSpec((1, D), lambda b, q: (0, 0)),          # LN beta
        ],
        out_specs=pl.BlockSpec((1, tq, D), lambda b, q: (b, q, 0)),
        scratch_shapes=[pltpu.VMEM((tq, D), _ACT_DTYPE)],       # packed head outs
        compiler_params=pltpu.CompilerParams(
            dimension_semantics=("parallel", "parallel"),
            vmem_limit_bytes=_vmem_limit(est)),
        cost_estimate=pl.CostEstimate(
            flops=int(flops),
            transcendentals=int(B * num_heads * L * S),
            bytes_accessed=int(bytes_acc)),
    )(x_q, x_kv, bias,
      p["wq"], p["bq"].reshape(1, D),
      p["wkv"], p["bkv"].reshape(1, 2 * D),
      p["wo"], p["bo"].reshape(1, D),
      ln_g.reshape(1, D), ln_b.reshape(1, D))


def ffn_block(x, w1, b1, w2, b2, ln_g, ln_b, eps=1e-5, activation="relu"):
    B, L, D = x.shape
    F = w1.shape[1]
    n = B * L
    tm, n_pad = _row_tile(n)

    x2 = x.astype(_ACT_DTYPE).reshape(n, D)
    if n_pad != n:
        x2 = jnp.pad(x2, ((0, n_pad - n), (0, 0)))

    est = (2 * 2 * 2 * D * F            # w1 + w2 bf16, double-buffered
           + 2 * 2 * 2 * tm * D         # x / out tiles bf16, double-buffered
           + 4 * tm * F)                # hidden activations f32

    out = pl.pallas_call(
        functools.partial(_ffn_block_kernel, eps=eps, activation=activation),
        out_shape=jax.ShapeDtypeStruct((n_pad, D), _ACT_DTYPE),
        grid=(n_pad // tm,),
        in_specs=[
            pl.BlockSpec((tm, D), lambda i: (i, 0)),
            pl.BlockSpec((D, F), lambda i: (0, 0)),             # w1 (resident)
            pl.BlockSpec((1, F), lambda i: (0, 0)),
            pl.BlockSpec((F, D), lambda i: (0, 0)),             # w2 (resident)
            pl.BlockSpec((1, D), lambda i: (0, 0)),
            pl.BlockSpec((1, D), lambda i: (0, 0)),
            pl.BlockSpec((1, D), lambda i: (0, 0)),
        ],
        out_specs=pl.BlockSpec((tm, D), lambda i: (i, 0)),
        compiler_params=pltpu.CompilerParams(
            dimension_semantics=("parallel",),
            vmem_limit_bytes=_vmem_limit(est)),
        cost_estimate=pl.CostEstimate(
            flops=int(4 * n_pad * D * F),
            transcendentals=int(n_pad),
            bytes_accessed=int(2 * 2 * n_pad * D + 2 * 2 * D * F)),
    )(x2, w1, b1.reshape(1, F), w2, b2.reshape(1, D),
      ln_g.reshape(1, D), ln_b.reshape(1, D))
    return out[:n].reshape(B, L, D)


def final_norm_projection(x, norm_g, norm_b, proj_w, proj_b, eps=1e-5):
    B, L, D = x.shape
    n = B * L
    V = proj_w.shape[1]
    # Pad vocab to a multiple of 128 for lane-dense (unmasked) stores / full MXU N.
    Vp = _round_up(V, 128)
    proj_w = proj_w.astype(_MXU_DTYPE)
    proj_b = proj_b.astype(jnp.float32)
    if Vp != V:
        proj_w = jnp.pad(proj_w, ((0, 0), (0, Vp - V)))
        proj_b = jnp.pad(proj_b, ((0, Vp - V),))

    tm, n_pad = _row_tile(n)        # large row tile => fewer proj_w re-streams
    tn = _col_tile(Vp)

    x2 = x.astype(_ACT_DTYPE).reshape(n, D)
    if n_pad != n:
        x2 = jnp.pad(x2, ((0, n_pad - n), (0, 0)))

    n_row_tiles = n_pad // tm
    est = (2 * 2 * D * tn           # proj_w tile bf16, double-buffered
           + 2 * 2 * tm * D         # x tile bf16, double-buffered
           + 2 * 4 * tm * tn        # out tile f32, double-buffered
           + 2 * tm * D)            # LN scratch bf16

    out = pl.pallas_call(
        functools.partial(_final_ln_proj_kernel, eps=eps),
        out_shape=jax.ShapeDtypeStruct((n_pad, Vp), jnp.float32),
        grid=(n_row_tiles, Vp // tn),
        in_specs=[
            pl.BlockSpec((tm, D), lambda i, j: (i, 0)),
            pl.BlockSpec((1, D), lambda i, j: (0, 0)),
            pl.BlockSpec((1, D), lambda i, j: (0, 0)),
            pl.BlockSpec((D, tn), lambda i, j: (0, j)),
            pl.BlockSpec((1, tn), lambda i, j: (0, j)),
        ],
        out_specs=pl.BlockSpec((tm, tn), lambda i, j: (i, j)),
        scratch_shapes=[pltpu.VMEM((tm, D), _ACT_DTYPE)],       # cached LayerNorm
        compiler_params=pltpu.CompilerParams(
            dimension_semantics=("parallel", "arbitrary"),      # j sequential: LN cache
            vmem_limit_bytes=_vmem_limit(est)),
        cost_estimate=pl.CostEstimate(
            flops=int(2 * n_pad * D * Vp),
            transcendentals=int(n_pad),
            bytes_accessed=int(2 * n_pad * D + 2 * D * Vp * n_row_tiles
                               + 4 * n_pad * Vp)),
    )(x2, norm_g.reshape(1, D), norm_b.reshape(1, D),
      proj_w, proj_b.reshape(1, Vp))
    return out[:n, :V].reshape(B, L, V)


# ----------------------------------------------------------------------------
# StackDecoder forward
# ----------------------------------------------------------------------------
def decoder_layer_forward(x, cross, lp, num_heads, *, activation="relu",
                          self_key_bias=None, self_full_mask=None,
                          cross_key_bias=None, cross_full_mask=None):
    # self-attention + O-proj + residual + norm1 (fused kernel)
    h = attention_block(x, x, lp["self_attn"], lp["ln1_g"], lp["ln1_b"],
                        num_heads=num_heads, causal=(self_full_mask is None),
                        key_bias=self_key_bias, full_bias=self_full_mask)
    # cross-attention + O-proj + residual + norm2 (fused kernel)
    h = attention_block(h, cross, lp["cross_attn"], lp["ln2_g"], lp["ln2_b"],
                        num_heads=num_heads, causal=False,
                        key_bias=cross_key_bias, full_bias=cross_full_mask)
    # feed-forward + residual + norm3 (fused kernel)
    h = ffn_block(h, lp["w1"], lp["b1"], lp["w2"], lp["b2"],
                  lp["ln3_g"], lp["ln3_b"], activation=activation)
    return h


def stack_decoder_forward(dec_embeds, cross, params, num_heads,
                          padding_mask=None, attn_mask=None, cross_mask=None,
                          activation="relu"):
    """`params` must have gone through prepare_params (bf16 weights, scale folded)."""
    self_full = None
    self_key = None
    if attn_mask is not None:
        self_full = attn_mask                       # explicit (B, L, L) additive mask
    elif padding_mask is not None:
        # TODO(synk): temporal_mask_expand convention assumed: padding_mask is a
        # (B, L) pad indicator (1 = padded decoder position), applied as a -1e9
        # additive bias over the self-attention keys (decoder-side length L).
        self_key = padding_mask.astype(jnp.float32) * (-1e9)

    cross_full = None
    cross_key = None
    if cross_mask is not None:
        if cross_mask.ndim == 3:
            cross_full = cross_mask                 # (B, L, S) additive mask
        else:
            # TODO(synk): (B, S) encoder pad indicator assumed (1 = padded key).
            cross_key = cross_mask.astype(jnp.float32) * (-1e9)

    cross = cross.astype(_ACT_DTYPE)                # cast once, reused by all layers
    decoding = dec_embeds
    for lp in params["layers"]:
        decoding = decoder_layer_forward(
            decoding, cross, lp, num_heads, activation=activation,
            self_key_bias=self_key, self_full_mask=self_full,
            cross_key_bias=cross_key, cross_full_mask=cross_full)

    # fused final LayerNorm + vocab projection
    return final_norm_projection(decoding, params["norm_g"], params["norm_b"],
                                 params["proj_w"], params["proj_b"])


# ----------------------------------------------------------------------------
# Parameters
# ----------------------------------------------------------------------------
def init_params(key, d_model, num_heads, dim_ff, num_layers, vocab_size):
    """Raw f32 parameters matching the PyTorch module layout."""
    def w(k, shape):
        return (jax.random.normal(k, shape, jnp.float32) * 0.02).astype(jnp.float32)

    def attn_params(k):
        ks = jax.random.split(k, 3)
        return dict(
            wq=w(ks[0], (d_model, d_model)),
            bq=jnp.zeros((d_model,), jnp.float32),
            wkv=w(ks[1], (d_model, 2 * d_model)),       # fused K|V projection
            bkv=jnp.zeros((2 * d_model,), jnp.float32),
            wo=w(ks[2], (d_model, d_model)),
            bo=jnp.zeros((d_model,), jnp.float32),
        )

    layers = []
    keys = jax.random.split(key, num_layers + 1)
    for lk in keys[:num_layers]:
        ks = jax.random.split(lk, 4)
        layers.append(dict(
            self_attn=attn_params(ks[0]),
            cross_attn=attn_params(ks[1]),
            w1=w(ks[2], (d_model, dim_ff)), b1=jnp.zeros((dim_ff,), jnp.float32),
            w2=w(ks[3], (dim_ff, d_model)), b2=jnp.zeros((d_model,), jnp.float32),
            ln1_g=jnp.ones((d_model,), jnp.float32), ln1_b=jnp.zeros((d_model,), jnp.float32),
            ln2_g=jnp.ones((d_model,), jnp.float32), ln2_b=jnp.zeros((d_model,), jnp.float32),
            ln3_g=jnp.ones((d_model,), jnp.float32), ln3_b=jnp.zeros((d_model,), jnp.float32),
        ))
    pk = keys[-1]
    return dict(
        layers=layers,
        norm_g=jnp.ones((d_model,), jnp.float32),
        norm_b=jnp.zeros((d_model,), jnp.float32),
        proj_w=w(pk, (d_model, vocab_size)),
        proj_b=jnp.zeros((vocab_size,), jnp.float32),
    )


def prepare_params(params, num_heads):
    """One-time transport prep: fold 1/sqrt(dh) into wq/bq and cast all weight
    matrices to bf16 (biases / LayerNorm params stay f32)."""
    d_model = params["norm_g"].shape[0]
    scale = 1.0 / math.sqrt(d_model // num_heads)

    def prep_attn(a):
        return dict(
            wq=(a["wq"].astype(jnp.float32) * scale).astype(_MXU_DTYPE),
            bq=a["bq"].astype(jnp.float32) * scale,
            wkv=a["wkv"].astype(_MXU_DTYPE),
            bkv=a["bkv"].astype(jnp.float32),
            wo=a["wo"].astype(_MXU_DTYPE),
            bo=a["bo"].astype(jnp.float32),
        )

    layers = []
    for lp in params["layers"]:
        layers.append(dict(
            self_attn=prep_attn(lp["self_attn"]),
            cross_attn=prep_attn(lp["cross_attn"]),
            w1=lp["w1"].astype(_MXU_DTYPE), b1=lp["b1"].astype(jnp.float32),
            w2=lp["w2"].astype(_MXU_DTYPE), b2=lp["b2"].astype(jnp.float32),
            ln1_g=lp["ln1_g"], ln1_b=lp["ln1_b"],
            ln2_g=lp["ln2_g"], ln2_b=lp["ln2_b"],
            ln3_g=lp["ln3_g"], ln3_b=lp["ln3_b"],
        ))
    return dict(
        layers=layers,
        norm_g=params["norm_g"].astype(jnp.float32),
        norm_b=params["norm_b"].astype(jnp.float32),
        proj_w=params["proj_w"].astype(_MXU_DTYPE),
        proj_b=params["proj_b"].astype(jnp.float32),
    )


# ----------------------------------------------------------------------------
if __name__ == "__main__":
    # small config consistent with the module
    B, L, S = 2, 8, 8
    d_model, num_heads, dim_ff = 32, 4, 64
    num_decoder_layers, dec_vocab_size = 2, 16

    key = jax.random.PRNGKey(0)
    k_params, k_dec, k_cross = jax.random.split(key, 3)
    raw_params = init_params(k_params, d_model, num_heads, dim_ff,
                             num_decoder_layers, dec_vocab_size)
    params = prepare_params(raw_params, num_heads)
    dec_embeds = jax.random.normal(k_dec, (B, L, d_model), jnp.float32)
    cross = jax.random.normal(k_cross, (B, S, d_model), jnp.float32)

    out = stack_decoder_forward(dec_embeds, cross, params, num_heads)
    out = jax.block_until_ready(out)
    assert out.shape == (B, L, dec_vocab_size)
    assert jnp.all(jnp.isfinite(out))
    print("KERNEL_OK")
</pallas_src>

<mosaic_0001>
module attributes {stable_mosaic.version = 11 : i64} {
  func.func @_attention_block_kernel(%arg0: i32, %arg1: i32, %arg2: memref<1x8x32xbf16, #tpu.memory_space<vmem>>, %arg3: memref<1x8x32xbf16, #tpu.memory_space<vmem>>, %arg4: memref<1x1x8xf32, #tpu.memory_space<vmem>>, %arg5: memref<32x32xbf16, #tpu.memory_space<vmem>>, %arg6: memref<1x32xf32, #tpu.memory_space<vmem>>, %arg7: memref<32x64xbf16, #tpu.memory_space<vmem>>, %arg8: memref<1x64xf32, #tpu.memory_space<vmem>>, %arg9: memref<32x32xbf16, #tpu.memory_space<vmem>>, %arg10: memref<1x32xf32, #tpu.memory_space<vmem>>, %arg11: memref<1x32xf32, #tpu.memory_space<vmem>>, %arg12: memref<1x32xf32, #tpu.memory_space<vmem>>, %arg13: memref<1x8x32xbf16, #tpu.memory_space<vmem>>, %arg14: memref<8x32xbf16, #tpu.memory_space<vmem>>) attributes {dimension_semantics = [#tpu.dimension_semantics<parallel>, #tpu.dimension_semantics<parallel>], iteration_bounds = array<i64: 2, 1>, scalar_prefetch = 0 : i64, scratch_operands = 1 : i64, tpu.core_type = #tpu.core_type<tc>, window_params = [{transform_indices = @transform_0, window_bounds = array<i64: 1, 8, 32>}, {transform_indices = @transform_1, window_bounds = array<i64: 1, 8, 32>}, {transform_indices = @transform_2, window_bounds = array<i64: 1, 1, 8>}, {pipeline_mode = #tpu.pipeline_mode<synchronous>, transform_indices = @transform_3, window_bounds = array<i64: 32, 32>}, {pipeline_mode = #tpu.pipeline_mode<synchronous>, transform_indices = @transform_4, window_bounds = array<i64: 1, 32>}, {pipeline_mode = #tpu.pipeline_mode<synchronous>, transform_indices = @transform_5, window_bounds = array<i64: 32, 64>}, {pipeline_mode = #tpu.pipeline_mode<synchronous>, transform_indices = @transform_6, window_bounds = array<i64: 1, 64>}, {pipeline_mode = #tpu.pipeline_mode<synchronous>, transform_indices = @transform_7, window_bounds = array<i64: 32, 32>}, {pipeline_mode = #tpu.pipeline_mode<synchronous>, transform_indices = @transform_8, window_bounds = array<i64: 1, 32>}, {pipeline_mode = #tpu.pipeline_mode<synchronous>, transform_indices = @transform_9, window_bounds = array<i64: 1, 32>}, {pipeline_mode = #tpu.pipeline_mode<synchronous>, transform_indices = @transform_10, window_bounds = array<i64: 1, 32>}, {transform_indices = @transform_11, window_bounds = array<i64: 1, 8, 32>}]} {
    %c0 = arith.constant 0 : index
    %c0_0 = arith.constant 0 : index
    %c0_1 = arith.constant 0 : index
    %0 = vector.load %arg2[%c0, %c0_0, %c0_1] : memref<1x8x32xbf16, #tpu.memory_space<vmem>>, vector<1x8x32xbf16>
    %1 = vector.shape_cast %0 : vector<1x8x32xbf16> to vector<8x32xbf16>
    %c0_2 = arith.constant 0 : index
    %c0_3 = arith.constant 0 : index
    %c0_4 = arith.constant 0 : index
    %2 = vector.load %arg3[%c0_2, %c0_3, %c0_4] : memref<1x8x32xbf16, #tpu.memory_space<vmem>>, vector<1x8x32xbf16>
    %3 = vector.shape_cast %2 : vector<1x8x32xbf16> to vector<8x32xbf16>
    %c0_5 = arith.constant 0 : index
    %c0_6 = arith.constant 0 : index
    %4 = vector.load %arg5[%c0_5, %c0_6] : memref<32x32xbf16, #tpu.memory_space<vmem>>, vector<32x32xbf16>
    %cst = arith.constant dense<0.000000e+00> : vector<8x32xf32>
    %5 = tpu.matmul %1, %4, %cst {dimension_numbers = #tpu.dot_dimension_numbers<[1], [0], [0], [1], [0, 0, 1, 1], [], []>} : vector<8x32xbf16>, vector<32x32xbf16>, vector<8x32xf32> -> vector<8x32xf32>
    %c0_7 = arith.constant 0 : index
    %c0_8 = arith.constant 0 : index
    %6 = vector.load %arg6[%c0_7, %c0_8] : memref<1x32xf32, #tpu.memory_space<vmem>>, vector<1x32xf32>
    %7 = vector.broadcast %6 : vector<1x32xf32> to vector<8x32xf32>
    %8 = arith.addf %5, %7 : vector<8x32xf32>
    %c0_9 = arith.constant 0 : index
    %c0_10 = arith.constant 0 : index
    %9 = vector.load %arg7[%c0_9, %c0_10] : memref<32x64xbf16, #tpu.memory_space<vmem>>, vector<32x64xbf16>
    %cst_11 = arith.constant dense<0.000000e+00> : vector<8x64xf32>
    %10 = tpu.matmul %3, %9, %cst_11 {dimension_numbers = #tpu.dot_dimension_numbers<[1], [0], [0], [1], [0, 0, 1, 1], [], []>} : vector<8x32xbf16>, vector<32x64xbf16>, vector<8x64xf32> -> vector<8x64xf32>
    %c0_12 = arith.constant 0 : index
    %c0_13 = arith.constant 0 : index
    %11 = vector.load %arg8[%c0_12, %c0_13] : memref<1x64xf32, #tpu.memory_space<vmem>>, vector<1x64xf32>
    %12 = vector.broadcast %11 : vector<1x64xf32> to vector<8x64xf32>
    %13 = arith.addf %10, %12 : vector<8x64xf32>
    %14 = vector.extract_strided_slice %13 {offsets = [0, 0], sizes = [8, 32], strides = [1, 1]} : vector<8x64xf32> to vector<8x32xf32>
    %15 = vector.extract_strided_slice %13 {offsets = [0, 32], sizes = [8, 32], strides = [1, 1]} : vector<8x64xf32> to vector<8x32xf32>
    %c0_14 = arith.constant 0 : index
    %c0_15 = arith.constant 0 : index
    %c0_16 = arith.constant 0 : index
    %16 = vector.load %arg4[%c0_14, %c0_15, %c0_16] : memref<1x1x8xf32, #tpu.memory_space<vmem>>, vector<1x1x8xf32>
    %17 = vector.shape_cast %16 : vector<1x1x8xf32> to vector<1x8xf32>
    %c8_i32 = arith.constant 8 : i32
    %18 = arith.muli %arg1, %c8_i32 : i32
    %19 = tpu.iota {dimensions = array<i32: 0>} : vector<8x8xi32>
    %20 = vector.broadcast %18 : i32 to vector<8x8xi32>
    %21 = arith.addi %20, %19 : vector<8x8xi32>
    %22 = tpu.iota {dimensions = array<i32: 1>} : vector<8x8xi32>
    %23 = arith.cmpi sgt, %22, %21 : vector<8x8xi32>
    %cst_17 = arith.constant -1.000000e+09 : f32
    %cst_18 = arith.constant 0.000000e+00 : f32
    %24 = vector.broadcast %cst_17 : f32 to vector<8x8xf32>
    %25 = vector.broadcast %cst_18 : f32 to vector<8x8xf32>
    %26 = arith.select %23, %24, %25 : vector<8x8xi1>, vector<8x8xf32>
    %27 = vector.broadcast %17 : vector<1x8xf32> to vector<8x8xf32>
    %28 = arith.addf %27, %26 : vector<8x8xf32>
    %29 = vector.extract_strided_slice %8 {offsets = [0, 0], sizes = [8, 8], strides = [1, 1]} : vector<8x32xf32> to vector<8x8xf32>
    %30 = vector.extract_strided_slice %14 {offsets = [0, 0], sizes = [8, 8], strides = [1, 1]} : vector<8x32xf32> to vector<8x8xf32>
    %31 = arith.truncf %29 : vector<8x8xf32> to vector<8x8xbf16>
    %32 = arith.truncf %30 : vector<8x8xf32> to vector<8x8xbf16>
    %cst_19 = arith.constant dense<0.000000e+00> : vector<8x8xf32>
    %33 = tpu.matmul %31, %32, %cst_19 {dimension_numbers = #tpu.dot_dimension_numbers<[1], [1], [0], [0], [0, 0, 1, 0], [], []>} : vector<8x8xbf16>, vector<8x8xbf16>, vector<8x8xf32> -> vector<8x8xf32>
    %34 = arith.addf %33, %28 : vector<8x8xf32>
    %cst_20 = arith.constant dense<0xFF800000> : vector<8xf32>
    %35 = vector.multi_reduction <maximumf>, %34, %cst_20 [1] : vector<8x8xf32> to vector<8xf32>
    %36 = vector.shape_cast %35 : vector<8xf32> to vector<8x1xf32>
    %37 = vector.broadcast %36 : vector<8x1xf32> to vector<8x8xf32>
    %38 = arith.subf %34, %37 : vector<8x8xf32>
    %39 = math.exp %38 : vector<8x8xf32>
    %cst_21 = arith.constant dense<0.000000e+00> : vector<8xf32>
    %40 = vector.multi_reduction <add>, %39, %cst_21 [1] : vector<8x8xf32> to vector<8xf32>
    %41 = vector.shape_cast %40 : vector<8xf32> to vector<8x1xf32>
    %42 = tpu.reciprocal %41 {approx = true} : vector<8x1xf32> -> vector<8x1xf32>
    %43 = vector.broadcast %42 : vector<8x1xf32> to vector<8x8xf32>
    %44 = arith.mulf %39, %43 : vector<8x8xf32>
    %45 = vector.extract_strided_slice %15 {offsets = [0, 0], sizes = [8, 8], strides = [1, 1]} : vector<8x32xf32> to vector<8x8xf32>
    %46 = arith.truncf %44 : vector<8x8xf32> to vector<8x8xbf16>
    %47 = arith.truncf %45 : vector<8x8xf32> to vector<8x8xbf16>
    %cst_22 = arith.constant dense<0.000000e+00> : vector<8x8xf32>
    %48 = tpu.matmul %46, %47, %cst_22 {dimension_numbers = #tpu.dot_dimension_numbers<[1], [0], [0], [1], [0, 0, 1, 1], [], []>} : vector<8x8xbf16>, vector<8x8xbf16>, vector<8x8xf32> -> vector<8x8xf32>
    %49 = arith.truncf %48 : vector<8x8xf32> to vector<8x8xbf16>
    %c0_23 = arith.constant 0 : index
    %c0_24 = arith.constant 0 : index
    %50 = vector.load %arg14[%c0_23, %c0_24] : memref<8x32xbf16, #tpu.memory_space<vmem>>, vector<8x8xbf16>
    tpu.vector_store %arg14[%c0_23, %c0_24], %49 {strides = array<i32>} : memref<8x32xbf16, #tpu.memory_space<vmem>>, vector<8x8xbf16>,
    %51 = vector.extract_strided_slice %8 {offsets = [0, 8], sizes = [8, 8], strides = [1, 1]} : vector<8x32xf32> to vector<8x8xf32>
    %52 = vector.extract_strided_slice %14 {offsets = [0, 8], sizes = [8, 8], strides = [1, 1]} : vector<8x32xf32> to vector<8x8xf32>
    %53 = arith.truncf %51 : vector<8x8xf32> to vector<8x8xbf16>
    %54 = arith.truncf %52 : vector<8x8xf32> to vector<8x8xbf16>
    %cst_25 = arith.constant dense<0.000000e+00> : vector<8x8xf32>
    %55 = tpu.matmul %53, %54, %cst_25 {dimension_numbers = #tpu.dot_dimension_numbers<[1], [1], [0], [0], [0, 0, 1, 0], [], []>} : vector<8x8xbf16>, vector<8x8xbf16>, vector<8x8xf32> -> vector<8x8xf32>
    %56 = arith.addf %55, %28 : vector<8x8xf32>
    %cst_26 = arith.constant dense<0xFF800000> : vector<8xf32>
    %57 = vector.multi_reduction <maximumf>, %56, %cst_26 [1] : vector<8x8xf32> to vector<8xf32>
    %58 = vector.shape_cast %57 : vector<8xf32> to vector<8x1xf32>
    %59 = vector.broadcast %58 : vector<8x1xf32> to vector<8x8xf32>
    %60 = arith.subf %56, %59 : vector<8x8xf32>
    %61 = math.exp %60 : vector<8x8xf32>
    %cst_27 = arith.constant dense<0.000000e+00> : vector<8xf32>
    %62 = vector.multi_reduction <add>, %61, %cst_27 [1] : vector<8x8xf32> to vector<8xf32>
    %63 = vector.shape_cast %62 : vector<8xf32> to vector<8x1xf32>
    %64 = tpu.reciprocal %63 {approx = true} : vector<8x1xf32> -> vector<8x1xf32>
    %65 = vector.broadcast %64 : vector<8x1xf32> to vector<8x8xf32>
    %66 = arith.mulf %61, %65 : vector<8x8xf32>
    %67 = vector.extract_strided_slice %15 {offsets = [0, 8], sizes = [8, 8], strides = [1, 1]} : vector<8x32xf32> to vector<8x8xf32>
    %68 = arith.truncf %66 : vector<8x8xf32> to vector<8x8xbf16>
    %69 = arith.truncf %67 : vector<8x8xf32> to vector<8x8xbf16>
    %cst_28 = arith.constant dense<0.000000e+00> : vector<8x8xf32>
    %70 = tpu.matmul %68, %69, %cst_28 {dimension_numbers = #tpu.dot_dimension_numbers<[1], [0], [0], [1], [0, 0, 1, 1], [], []>} : vector<8x8xbf16>, vector<8x8xbf16>, vector<8x8xf32> -> vector<8x8xf32>
    %71 = arith.truncf %70 : vector<8x8xf32> to vector<8x8xbf16>
    %c0_29 = arith.constant 0 : index
    %c8 = arith.constant 8 : index
    %72 = vector.load %arg14[%c0_29, %c8] : memref<8x32xbf16, #tpu.memory_space<vmem>>, vector<8x8xbf16>
    tpu.vector_store %arg14[%c0_29, %c8], %71 {strides = array<i32>} : memref<8x32xbf16, #tpu.memory_space<vmem>>, vector<8x8xbf16>,
    %73 = vector.extract_strided_slice %8 {offsets = [0, 16], sizes = [8, 8], strides = [1, 1]} : vector<8x32xf32> to vector<8x8xf32>
    %74 = vector.extract_strided_slice %14 {offsets = [0, 16], sizes = [8, 8], strides = [1, 1]} : vector<8x32xf32> to vector<8x8xf32>
    %75 = arith.truncf %73 : vector<8x8xf32> to vector<8x8xbf16>
    %76 = arith.truncf %74 : vector<8x8xf32> to vector<8x8xbf16>
    %cst_30 = arith.constant dense<0.000000e+00> : vector<8x8xf32>
    %77 = tpu.matmul %75, %76, %cst_30 {dimension_numbers = #tpu.dot_dimension_numbers<[1], [1], [0], [0], [0, 0, 1, 0], [], []>} : vector<8x8xbf16>, vector<8x8xbf16>, vector<8x8xf32> -> vector<8x8xf32>
    %78 = arith.addf %77, %28 : vector<8x8xf32>
    %cst_31 = arith.constant dense<0xFF800000> : vector<8xf32>
    %79 = vector.multi_reduction <maximumf>, %78, %cst_31 [1] : vector<8x8xf32> to vector<8xf32>
    %80 = vector.shape_cast %79 : vector<8xf32> to vector<8x1xf32>
    %81 = vector.broadcast %80 : vector<8x1xf32> to vector<8x8xf32>
    %82 = arith.subf %78, %81 : vector<8x8xf32>
    %83 = math.exp %82 : vector<8x8xf32>
    %cst_32 = arith.constant dense<0.000000e+00> : vector<8xf32>
    %84 = vector.multi_reduction <add>, %83, %cst_32 [1] : vector<8x8xf32> to vector<8xf32>
    %85 = vector.shape_cast %84 : vector<8xf32> to vector<8x1xf32>
    %86 = tpu.reciprocal %85 {approx = true} : vector<8x1xf32> -> vector<8x1xf32>
    %87 = vector.broadcast %86 : vector<8x1xf32> to vector<8x8xf32>
    %88 = arith.mulf %83, %87 : vector<8x8xf32>
    %89 = vector.extract_strided_slice %15 {offsets = [0, 16], sizes = [8, 8], strides = [1, 1]} : vector<8x32xf32> to vector<8x8xf32>
    %90 = arith.truncf %88 : vector<8x8xf32> to vector<8x8xbf16>
    %91 = arith.truncf %89 : vector<8x8xf32> to vector<8x8xbf16>
    %cst_33 = arith.constant dense<0.000000e+00> : vector<8x8xf32>
    %92 = tpu.matmul %90, %91, %cst_33 {dimension_numbers = #tpu.dot_dimension_numbers<[1], [0], [0], [1], [0, 0, 1, 1], [], []>} : vector<8x8xbf16>, vector<8x8xbf16>, vector<8x8xf32> -> vector<8x8xf32>
    %93 = arith.truncf %92 : vector<8x8xf32> to vector<8x8xbf16>
    %c0_34 = arith.constant 0 : index
    %c16 = arith.constant 16 : index
    %94 = vector.load %arg14[%c0_34, %c16] : memref<8x32xbf16, #tpu.memory_space<vmem>>, vector<8x8xbf16>
    tpu.vector_store %arg14[%c0_34, %c16], %93 {strides = array<i32>} : memref<8x32xbf16, #tpu.memory_space<vmem>>, vector<8x8xbf16>,
    %95 = vector.extract_strided_slice %8 {offsets = [0, 24], sizes = [8, 8], strides = [1, 1]} : vector<8x32xf32> to vector<8x8xf32>
    %96 = vector.extract_strided_slice %14 {offsets = [0, 24], sizes = [8, 8], strides = [1, 1]} : vector<8x32xf32> to vector<8x8xf32>
    %97 = arith.truncf %95 : vector<8x8xf32> to vector<8x8xbf16>
    %98 = arith.truncf %96 : vector<8x8xf32> to vector<8x8xbf16>
    %cst_35 = arith.constant dense<0.000000e+00> : vector<8x8xf32>
    %99 = tpu.matmul %97, %98, %cst_35 {dimension_numbers = #tpu.dot_dimension_numbers<[1], [1], [0], [0], [0, 0, 1, 0], [], []>} : vector<8x8xbf16>, vector<8x8xbf16>, vector<8x8xf32> -> vector<8x8xf32>
    %100 = arith.addf %99, %28 : vector<8x8xf32>
    %cst_36 = arith.constant dense<0xFF800000> : vector<8xf32>
    %101 = vector.multi_reduction <maximumf>, %100, %cst_36 [1] : vector<8x8xf32> to vector<8xf32>
    %102 = vector.shape_cast %101 : vector<8xf32> to vector<8x1xf32>
    %103 = vector.broadcast %102 : vector<8x1xf32> to vector<8x8xf32>
    %104 = arith.subf %100, %103 : vector<8x8xf32>
    %105 = math.exp %104 : vector<8x8xf32>
    %cst_37 = arith.constant dense<0.000000e+00> : vector<8xf32>
    %106 = vector.multi_reduction <add>, %105, %cst_37 [1] : vector<8x8xf32> to vector<8xf32>
    %107 = vector.shape_cast %106 : vector<8xf32> to vector<8x1xf32>
    %108 = tpu.reciprocal %107 {approx = true} : vector<8x1xf32> -> vector<8x1xf32>
    %109 = vector.broadcast %108 : vector<8x1xf32> to vector<8x8xf32>
    %110 = arith.mulf %105, %109 : vector<8x8xf32>
    %111 = vector.extract_strided_slice %15 {offsets = [0, 24], sizes = [8, 8], strides = [1, 1]} : vector<8x32xf32> to vector<8x8xf32>
    %112 = arith.truncf %110 : vector<8x8xf32> to vector<8x8xbf16>
    %113 = arith.truncf %111 : vector<8x8xf32> to vector<8x8xbf16>
    %cst_38 = arith.constant dense<0.000000e+00> : vector<8x8xf32>
    %114 = tpu.matmul %112, %113, %cst_38 {dimension_numbers = #tpu.dot_dimension_numbers<[1], [0], [0], [1], [0, 0, 1, 1], [], []>} : vector<8x8xbf16>, vector<8x8xbf16>, vector<8x8xf32> -> vector<8x8xf32>
    %115 = arith.truncf %114 : vector<8x8xf32> to vector<8x8xbf16>
    %c0_39 = arith.constant 0 : index
    %c24 = arith.constant 24 : index
    %116 = vector.load %arg14[%c0_39, %c24] : memref<8x32xbf16, #tpu.memory_space<vmem>>, vector<8x8xbf16>
    tpu.vector_store %arg14[%c0_39, %c24], %115 {strides = array<i32>} : memref<8x32xbf16, #tpu.memory_space<vmem>>, vector<8x8xbf16>,
    %c0_40 = arith.constant 0 : index
    %c0_41 = arith.constant 0 : index
    %117 = vector.load %arg14[%c0_40, %c0_41] : memref<8x32xbf16, #tpu.memory_space<vmem>>, vector<8x32xbf16>
    %c0_42 = arith.constant 0 : index
    %c0_43 = arith.constant 0 : index
    %118 = vector.load %arg9[%c0_42, %c0_43] : memref<32x32xbf16, #tpu.memory_space<vmem>>, vector<32x32xbf16>
    %cst_44 = arith.constant dense<0.000000e+00> : vector<8x32xf32>
    %119 = tpu.matmul %117, %118, %cst_44 {dimension_numbers = #tpu.dot_dimension_numbers<[1], [0], [0], [1], [0, 0, 1, 1], [], []>} : vector<8x32xbf16>, vector<32x32xbf16>, vector<8x32xf32> -> vector<8x32xf32>
    %c0_45 = arith.constant 0 : index
    %c0_46 = arith.constant 0 : index
    %120 = vector.load %arg10[%c0_45, %c0_46] : memref<1x32xf32, #tpu.memory_space<vmem>>, vector<1x32xf32>
    %121 = vector.broadcast %120 : vector<1x32xf32> to vector<8x32xf32>
    %122 = arith.addf %119, %121 : vector<8x32xf32>
    %123 = arith.extf %1 : vector<8x32xbf16> to vector<8x32xf32>
    %124 = arith.addf %122, %123 : vector<8x32xf32>
    %c0_47 = arith.constant 0 : index
    %c0_48 = arith.constant 0 : index
    %125 = vector.load %arg11[%c0_47, %c0_48] : memref<1x32xf32, #tpu.memory_space<vmem>>, vector<1x32xf32>
    %c0_49 = arith.constant 0 : index
    %c0_50 = arith.constant 0 : index
    %126 = vector.load %arg12[%c0_49, %c0_50] : memref<1x32xf32, #tpu.memory_space<vmem>>, vector<1x32xf32>
    %cst_51 = arith.constant dense<0.000000e+00> : vector<8xf32>
    %127 = vector.multi_reduction <add>, %124, %cst_51 [1] : vector<8x32xf32> to vector<8xf32>
    %128 = vector.shape_cast %127 : vector<8xf32> to vector<8x1xf32>
    %cst_52 = arith.constant 3.200000e+01 : f32
    %129 = vector.broadcast %cst_52 : f32 to vector<8x1xf32>
    %130 = arith.divf %128, %129 : vector<8x1xf32>
    %131 = vector.broadcast %130 : vector<8x1xf32> to vector<8x32xf32>
    %132 = arith.subf %124, %131 : vector<8x32xf32>
    %133 = arith.mulf %132, %132 : vector<8x32xf32>
    %cst_53 = arith.constant dense<0.000000e+00> : vector<8xf32>
    %134 = vector.multi_reduction <add>, %133, %cst_53 [1] : vector<8x32xf32> to vector<8xf32>
    %135 = vector.shape_cast %134 : vector<8xf32> to vector<8x1xf32>
    %cst_54 = arith.constant 3.200000e+01 : f32
    %136 = vector.broadcast %cst_54 : f32 to vector<8x1xf32>
    %137 = arith.divf %135, %136 : vector<8x1xf32>
    %cst_55 = arith.constant 9.99999974E-6 : f32
    %138 = vector.broadcast %cst_55 : f32 to vector<8x1xf32>
    %139 = arith.addf %137, %138 : vector<8x1xf32>
    %140 = math.rsqrt %139 : vector<8x1xf32>
    %141 = vector.broadcast %140 : vector<8x1xf32> to vector<8x32xf32>
    %142 = arith.mulf %132, %141 : vector<8x32xf32>
    %143 = vector.broadcast %125 : vector<1x32xf32> to vector<8x32xf32>
    %144 = arith.mulf %142, %143 : vector<8x32xf32>
    %145 = vector.broadcast %126 : vector<1x32xf32> to vector<8x32xf32>
    %146 = arith.addf %144, %145 : vector<8x32xf32>
    %147 = arith.truncf %146 : vector<8x32xf32> to vector<8x32xbf16>
    %c0_56 = arith.constant 0 : index
    %c0_57 = arith.constant 0 : index
    %c0_58 = arith.constant 0 : index
    %148 = vector.load %arg13[%c0_56, %c0_57, %c0_58] : memref<1x8x32xbf16, #tpu.memory_space<vmem>>, vector<1x8x32xbf16>
    %149 = vector.shape_cast %148 : vector<1x8x32xbf16> to vector<8x32xbf16>
    %150 = vector.shape_cast %147 : vector<8x32xbf16> to vector<1x8x32xbf16>
    tpu.vector_store %arg13[%c0_56, %c0_57, %c0_58], %150 {strides = array<i32>} : memref<1x8x32xbf16, #tpu.memory_space<vmem>>, vector<1x8x32xbf16>,
    return
  }
  func.func @transform_0(%arg0: i32, %arg1: i32) -> (i32, i32, i32) {
    %c0_i32 = arith.constant 0 : i32
    %c0_i32_0 = arith.constant 0 : i32
    return %arg0, %arg1, %c0_i32 : i32, i32, i32
  }
  func.func @transform_1(%arg0: i32, %arg1: i32) -> (i32, i32, i32) {
    %c0_i32 = arith.constant 0 : i32
    %c0_i32_0 = arith.constant 0 : i32
    %c0_i32_1 = arith.constant 0 : i32
    return %arg0, %c0_i32, %c0_i32_0 : i32, i32, i32
  }
  func.func @transform_2(%arg0: i32, %arg1: i32) -> (i32, i32, i32) {
    %c0_i32 = arith.constant 0 : i32
    %c0_i32_0 = arith.constant 0 : i32
    %c0_i32_1 = arith.constant 0 : i32
    return %arg0, %c0_i32, %c0_i32_0 : i32, i32, i32
  }
  func.func @transform_3(%arg0: i32, %arg1: i32) -> (i32, i32) {
    %c0_i32 = arith.constant 0 : i32
    %c0_i32_0 = arith.constant 0 : i32
    %c0_i32_1 = arith.constant 0 : i32
    return %c0_i32, %c0_i32_0 : i32, i32
  }
  func.func @transform_4(%arg0: i32, %arg1: i32) -> (i32, i32) {
    %c0_i32 = arith.constant 0 : i32
    %c0_i32_0 = arith.constant 0 : i32
    %c0_i32_1 = arith.constant 0 : i32
    return %c0_i32, %c0_i32_0 : i32, i32
  }
  func.func @transform_5(%arg0: i32, %arg1: i32) -> (i32, i32) {
    %c0_i32 = arith.constant 0 : i32
    %c0_i32_0 = arith.constant 0 : i32
    %c0_i32_1 = arith.constant 0 : i32
    return %c0_i32, %c0_i32_0 : i32, i32
  }
  func.func @transform_6(%arg0: i32, %arg1: i32) -> (i32, i32) {
    %c0_i32 = arith.constant 0 : i32
    %c0_i32_0 = arith.constant 0 : i32
    %c0_i32_1 = arith.constant 0 : i32
    return %c0_i32, %c0_i32_0 : i32, i32
  }
  func.func @transform_7(%arg0: i32, %arg1: i32) -> (i32, i32) {
    %c0_i32 = arith.constant 0 : i32
    %c0_i32_0 = arith.constant 0 : i32
    %c0_i32_1 = arith.constant 0 : i32
    return %c0_i32, %c0_i32_0 : i32, i32
  }
  func.func @transform_8(%arg0: i32, %arg1: i32) -> (i32, i32) {
    %c0_i32 = arith.constant 0 : i32
    %c0_i32_0 = arith.constant 0 : i32
    %c0_i32_1 = arith.constant 0 : i32
    return %c0_i32, %c0_i32_0 : i32, i32
  }
  func.func @transform_9(%arg0: i32, %arg1: i32) -> (i32, i32) {
    %c0_i32 = arith.constant 0 : i32
    %c0_i32_0 = arith.constant 0 : i32
    %c0_i32_1 = arith.constant 0 : i32
    return %c0_i32, %c0_i32_0 : i32, i32
  }
  func.func @transform_10(%arg0: i32, %arg1: i32) -> (i32, i32) {
    %c0_i32 = arith.constant 0 : i32
    %c0_i32_0 = arith.constant 0 : i32
    %c0_i32_1 = arith.constant 0 : i32
    return %c0_i32, %c0_i32_0 : i32, i32
  }
  func.func @transform_11(%arg0: i32, %arg1: i32) -> (i32, i32, i32) {
    %c0_i32 = arith.constant 0 : i32
    %c0_i32_0 = arith.constant 0 : i32
    return %arg0, %arg1, %c0_i32 : i32, i32, i32
  }
}

</mosaic_0001>

<bundles_post_ra>
// kernel: tpu_custom_call.1
= control target key start
LH: loop header
LB: loop body
LE: loop exit
PB: predicated region body
PF: predicated region fallthrough
CT: control target
= control target key end

     0   :  { %s1959_s0 = inlined_call_operand.hbm [shape: bf16[2,8,32], index: 0, kind: input, shape index: {}]   ;;  %s1960_s1 = inlined_call_operand.hbm [shape: bf16[2,8,32], index: 1, kind: input, shape index: {}]   ;;  %s1961_s2 = inlined_call_operand.hbm [shape: f32[2,1,8], index: 2, kind: input, shape index: {}]   ;;  %s1962_s3 = inlined_call_operand.hbm [shape: bf16[32,32], index: 3, kind: input, shape index: {}]   ;;  %s1963_s4 = inlined_call_operand.vmem [shape: f32[1,32], index: 4, kind: input, shape index: {}]   ;;  %s1964_s5 = inlined_call_operand.hbm [shape: bf16[32,64], index: 5, kind: input, shape index: {}]   ;;  %s1965_s6 = inlined_call_operand.vmem [shape: f32[1,64], index: 6, kind: input, shape index: {}]   ;;  %s1966_s7 = inlined_call_operand.hbm [shape: bf16[32,32], index: 7, kind: input, shape index: {}]   ;;  %s1967_s8 = inlined_call_operand.vmem [shape: f32[1,32], index: 8, kind: input, shape index: {}]   ;;  %s1968_s9 = inlined_call_operand.vmem [shape: f32[1,32], index: 9, kind: input, shape index: {}]   ;;  %s1969_s10 = inlined_call_operand.vmem [shape: f32[1,32], index: 10, kind: input, shape index: {}]   ;;  %s1970_s11 = inlined_call_operand.hbm [shape: bf16[2,8,32], index: 11, kind: output, shape index: {}]  }
   0x1   :  { %1984 = sst [smem:[#allocation28_spill]] %s1960_s1 }
   0x2   :  { %1985 = sst [smem:[#allocation29_spill]] %s1962_s3 }
   0x3   :  { %1986 = sst [smem:[#allocation30_spill]] %s1964_s5 }
   0x4   :  { %1987 = sst [smem:[#allocation31_spill]] %s1966_s7 }
   0x5   :  { %1988 = sst [smem:[#allocation32_spill]] %s1967_s8 }
   0x6   :  { %1989 = sst [smem:[#allocation33_spill]] %s1968_s9 }
   0x7   :  { %1990 = sst [smem:[#allocation34_spill]] %s1969_s10 }
   0x8   :  { %1991 = sst [smem:[#allocation35_spill]] %s1970_s11 }
   0x9   :  { %16 = vsyncpa [#allocation4], 0 }
   0xa   :  { %18 = vsyncpa [#allocation4 + $0x1], 0 }
   0xb   :  { %19 = vsyncpa [#allocation7], 0 }
   0xc   :  { %21 = vsyncpa [#allocation7 + $0x1], 0 }
   0xd   :  { %22 = vsyncpa [#allocation10], 0 }
   0xe   :  { %23 = vsyncpa [#allocation13], 0 }
   0xf   :  { %24 = vsyncpa [#allocation5], 0 }
  0x10   :  { %26 = vsyncpa [#allocation5 + $0x1], 0  ;;  %s1687_s17 = smov 0   ;;  %s1689_s18 = smov 0  }
  0x11   :  { %s1691_s19 = smov 0   ;;  %s1693_s20 = smov 0  }
  0x12   :  { %s1695_s21 = smov 0   ;;  %s1697_s22 = smov 0  }
  0x13 LB: > { %1992 = sst [smem:[#allocation20_spill]] %s1588_s17  ;;  %s1718_s23 = sadd.s32 4294967295, %s1608_s22   ;;  %s1608_s22 = sphi %s1697_s22, %s32_s22   ;;  %s1604_s21 = sphi %s1695_s21, %s2030_s21   ;;  %s1600_s20 = sphi %s1693_s20, %s2029_s20   ;;  %s1596_s19 = sphi %s1691_s19, %s2028_s19   ;;  %s1592_s18 = sphi %s1689_s18, %s2027_s18   ;;  %s1588_s17 = sphi %s1687_s17, %s2026_s17  }
  0x14   : > { %1993 = sst [smem:[#allocation21_spill]] %s1596_s19  ;;  %p1130_p0 = scmp.ge.s32.totalorder %s1608_s22, 1 }
  0x15   : > { %1994 = sst [smem:[#allocation22_spill]] %s1600_s20  ;;  %p67_p1 = scmp.eq.s32.totalorder %s1718_s23, 0 }
  0x16   : > { %1995 = sst [smem:[#allocation23_spill]] %s1608_s22  ;;  %p325_p2 = scmp.lt.s32.totalorder %s1608_s22, 3 }
  0x17   : > { %s1996_s3 = sld [smem:[#allocation29_spill]]  ;;  %s1610_s28 = smov [#allocation9]  }
  0x18   : > { %p1726_p3 = pnand %p1130_p0, %p325_p2  ;;  %s338_s29 = sshll.u32 %s1610_s28, 4  ;;  %s339_s29 = int_to_ptr.vmem [resolvable:$true] %s338_s29 }
  0x19   : > { %s1971_s12 = smov 64   ;;  %s1973_s13 = smov 4  }
  0x1a   : > { %p1211_p4 = pneg %p1726_p3  ;;  %s1129_s14 = sadd.s32 4294967294, %s1608_s22  }
  0x1b   : > { %s44_s15 = sadd.s32 1, %s1604_s21  ;;  %s53_s16 = sadd.s32 1, %s1596_s19 }
  0x1c   : > { %p1734_p5 = pnand %p1211_p4, %p67_p1  ;;  %p46_p7 = scmp.ge.s32.totalorder %s44_s15, 2 }
  0x1d   : > { %s336_s26 = sshll.u32 %s1996_s3, 4  ;;  %p60_p8 = scmp.ne.s32.totalorder %s1596_s19, %s1592_s18  ;;  %s337_s26 = int_to_ptr.hbm [resolvable:$true] %s336_s26 }
  0x1e   : > { %1214 = dma.hbm_to_vmem [thread:$0]  (!%p1734_p5), %s337_s26, 256, %s339_s29, [#allocation10], %s1971_s12, %s1971_s12, %s1973_s13  }
  0x1f   : > { %p61_p9 = scmp.eq.s32.totalorder %s1608_s22, 0  ;;  %p66_p10 = scmp.ne.s32.totalorder %s1592_s18, %s1588_s17 }
  0x20   : > { %s2032_s15 = smov (%p46_p7, %s44_s15), 0  ;;  %p312_p13 = scmp.eq.s32.totalorder %s1718_s23, 1 }
  0x21   : > { %1999 = sst [smem:[#allocation24_spill]] %s2032_s15  ;;  %p1754_p11 = por %p61_p9, %p60_p8 }
  0x22   : > { %p1760_p12 = por %p67_p1, %p66_p10  ;;  %s48_s26 = ssub.s32 %s1604_s21, %s2032_s15 }
  0x23   : > { %p51_p0 = scmp.eq.s32.totalorder %s48_s26, 0  ;;  %p318_p2 = scmp.eq.s32.totalorder %s1129_s14, 1 }
  0x24   : > { %p1767_p4 = por %p312_p13, %p60_p8  ;;  %p1238_p7 = scmp.lt.s32.totalorder %s1608_s22, 2 }
  0x25   : > { %s1773_s29 = scalar_select %p51_p0, %s1596_s19, %s53_s16  }
  0x26   : > { %s2002_s28 = scalar_select %p1767_p4, 1, 0 }
  0x27   : > { %2004 = sst [smem:[#allocation26_spill]] %s1773_s29  ;;  %p1775_p9 = por %p318_p2, %p66_p10 }
  0x28   : > { %2003 = sst [smem:[#allocation25_spill]] %s2002_s28  ;;  %s1780_s13 = sand.u32 1, %s1596_s19  }
  0x29   : > { %s2005_s12 = scalar_select %p1775_p9, 1, 0 }
  0x2a   : > { %s1135_s3 = sshll.u32 %s1780_s13, 2  ;;  %s1136_s17 = sshll.u32 %s1604_s21, 2 }
  0x2b   : > { %2006 = sst [smem:[#allocation27_spill]] %s2005_s12  ;;  %p1786_p6 = pnand %p1238_p7, %p1754_p11 }
  0x2c   : > { %s415_s14 = sand.u32 1, %s1608_s22   ;;  %s2008_s1 = sld [smem:[#allocation28_spill]] }
  0x2d   : > { %s419_s11 = scalar_lea.vmem [#allocation6], %s1135_s3  ;;  %s1794_s19 = scalar_lea.sflag [#allocation7], %s415_s14 }
  0x2e   : > { %s427_s12 = sshll.u32 %s419_s11, 4  ;;  %s2009_s5 = sld [smem:[#allocation30_spill]]  ;;  %s428_s12 = int_to_ptr.vmem [resolvable:$true] %s427_s12 }
  0x2f   : > { %s1613_s22 = smov [#allocation11]   ;;  %s2010_s7 = sld [smem:[#allocation31_spill]] }
  0x30   : > { %s355_s15 = sshll.u32 %s1613_s22, 4  ;;  %s2011_s14 = smov 4   ;;  %s356_s15 = int_to_ptr.vmem [resolvable:$true] %s355_s15 }
  0x31   : > { %s1614_s10 = smov [#allocation12]   ;;  %s404_s24 = scalar_lea.hbm %s1959_s0, %s1136_s17 }
  0x32   : > { %s423_s29 = scalar_lea.hbm %s2008_s1, %s1136_s17  ;;  %s2012_s1 = smov 64  }
  0x33   : > { %s425_s28 = sshll.u32 %s423_s29, 4  ;;  %s399_s29 = scalar_lea.vmem [#allocation3], %s1135_s3  ;;  %s426_s28 = int_to_ptr.hbm [resolvable:$true] %s425_s28 }
  0x34   : > { %1227 = dma.hbm_to_vmem [thread:$0]  (!%p1786_p6), %s426_s28, 64, %s428_s12, %s1794_s19  }
  0x35   : > { %s353_s9 = sshll.u32 %s2009_s5, 4  ;;  %s370_s16 = sshll.u32 %s2010_s7, 4  ;;  %s354_s9 = int_to_ptr.hbm [resolvable:$true] %s353_s9  ;;  %s371_s16 = int_to_ptr.hbm [resolvable:$true] %s370_s16 }
  0x36   : > { %1217 = dma.hbm_to_vmem [thread:$0]  (!%p1734_p5), %s354_s9, 256, %s356_s15, [#allocation10], %s2012_s1, %s2012_s1, %s2011_s14  }
  0x37   : > { %s372_s12 = sshll.u32 %s1614_s10, 4  ;;  %s408_s11 = sshll.u32 %s399_s29, 4  ;;  %s373_s12 = int_to_ptr.vmem [resolvable:$true] %s372_s12  ;;  %s409_s11 = int_to_ptr.vmem [resolvable:$true] %s408_s11 }
  0x38   : > { %1220 = dma.hbm_to_vmem [thread:$0]  (!%p1734_p5), %s371_s16, 256, %s373_s12, [#allocation13], %s2012_s1, %s2012_s1, %s2011_s14  }
  0x39   : > { %s406_s5 = sshll.u32 %s404_s24, 4  ;;  %s396_s9 = scalar_lea.sflag [#allocation4], %s1780_s13  ;;  %s407_s5 = int_to_ptr.hbm [resolvable:$true] %s406_s5 }
  0x3a   : > { %1224 = dma.hbm_to_vmem [thread:$0]  (!%p1786_p6), %s407_s5, 64, %s409_s11, %s396_s9  }
  0x3b   : > { %s440_s10 = scalar_lea.hbm %s1961_s2, %s1604_s21  ;;  %s437_s7 = scalar_lea.vmem [#allocation8], %s1780_s13 }
  0x3c   : > { %s444_s20 = sshll.u32 %s437_s7, 4  ;;  %s442_s8 = sshll.u32 %s440_s10, 4  ;;  %s445_s20 = int_to_ptr.vmem [resolvable:$true] %s444_s20  ;;  %s443_s8 = int_to_ptr.hbm [resolvable:$true] %s442_s8 }
  0x3d   : > { %1230 = dma.hbm_to_vmem [thread:$0]  (!%p1786_p6), %s443_s8, 16, %s445_s20, %s1794_s19  }
  0x3e   : > { %453 = sbr.rel (%p1726_p3) target bundleno = 1681 (0x691), region = 64  ;;  %s1832_s1 = sand.u32 (!%p1726_p3), 1, %s1592_s18  }
  0x3f   : > { %s1835_s3 = sshll.u32 (!%p1726_p3), %s1832_s1, 2  ;;  %s456_s5 = scalar_lea.sflag (!%p1726_p3), [#allocation4], %s1832_s1 }
  0x40   : > { %s459_s17 = scalar_lea.vmem (!%p1726_p3), [#allocation3], %s1835_s3 }
  0x43   : > { %1567 = dma.done.wait (%p1760_p12), %s456_s5, 64  }
  0x44   : > { %1569 = vsyncadd (%p1760_p12), %s456_s5, 4294967232  ;;  %s465_s7 = sand.u32 1, %s1718_s23   ;;  %s469_s19 = scalar_lea.vmem [#allocation6], %s1835_s3 }
  0x45   : > { %s466_s8 = scalar_lea.sflag [#allocation7], %s465_s7 }
  0x46   : > { %1571 = dma.done.wait (%p1760_p12), %s466_s8, 80  }
  0x47   : > { %1573 = vsyncadd (%p1760_p12), %s466_s8, 4294967216  ;;  %s478_s20 = scalar_lea.vmem [#allocation8], %s1832_s1 }
  0x48   : > { %1575 = dma.done.wait (%p67_p1), [#allocation10], 512  }
  0x49   : > { %1577 = vsyncadd (%p67_p1), [#allocation10], 4294966784 }
  0x4a   : > { %1579 = dma.done.wait (%p67_p1), [#allocation13], 256  }
  0x4b   : > { %1581 = vsyncadd (%p67_p1), [#allocation13], 4294967040  ;;  %v1186_v0 = vld [vmem:[#allocation9 + $0x8] sm:$0xff]  ;;  %v1188_v1 = vld [vmem:[#allocation11 + $0x8] sm:$0xff]  ;;  %vm565_vm0 = vcmask 261120   ;;  %vm634_vm1 = vcmask 64512   ;;  %v620_v24 = vlaneseq }
  0x4c   : > { %v1185_v2 = vld [vmem:[#allocation9] sm:$0xff]  ;;  %575 = vmatpush.bf16.msra.mxu0 %v1186_v0  ;;  %611 = vmatpush.bf16.msra.mxu1 %v1188_v1  ;;  %v1187_v3 = vld [vmem:[#allocation11] sm:$0xff]  ;;  %v1308_v6 = vld [vmem:[%s1963_s4] ss:$0 sm:$0xff]  ;;  %s1615_s26 = smov 96   ;;  %s1616_s16 = smov 120  }
  0x4d   : > { %v1858_v4 = vld [vmem:[%s459_s17] sm:$0xf]  ;;  %v544_v5 = vld [vmem:[%s469_s19] sm:$0xf]  ;;  %v1309_v7 = vld [vmem:[%s1965_s6] ss:$0 sm:$0xff] }
  0x4e   : > { %s1617_s14 = smov 112   ;;  %s1618_s12 = smov 104   ;;  %vm672_vm2 = vcmask 1043456   ;;  %v621_v25 = vshrl.u32 %v620_v24, 7  ;;  %v625_v26 = vand.u32 127, %v620_v24  ;;  %v1619_v29 = vmov 0.0  }
  0x4f   : > { %v1310_v28 = vld [vmem:[%s478_s20] ss:$0 sm:$0xff]  ;;  %vm690_vm4 = vcmask 60416   ;;  %s1620_s22 = smov 88   ;;  %s1621_s28 = smov 80   ;;  %vm754_vm5 = vcmask 126016  }
  0x50   : > { %576 = vmatpush.bf16.msra.mxu0 %v1185_v2  ;;  %612 = vmatpush.bf16.msra.mxu1 %v1187_v3  ;;  %vm626_vm3 = vcmp.gt.s32.totalorder %v625_v26, %v621_v25  ;;  %s1622_s24 = smov 72   ;;  %s1623_s29 = smov 8   ;;  %vm817_vm6 = vcmask 191616   ;;  %vm880_vm7 = vcmask 257216   ;;  %vm961_vm12 = vcmask 257024  }
  0x51   : > { %v627_v30 = vsel %vm626_vm3, -1e+09, %v1619_v29  ;;  %s1624_s11 = smov 16   ;;  %s1625_s9 = smov 24  }
  0x52   : > { %v631_v31 = vadd.f32 %v1310_v28, %v627_v30  ;;  %s2013_s10 = sld [smem:[#allocation32_spill]] }
  0x53   : > { %1154 = vmatmul.msk.bf16.vlgmr.msra.gmra.mxu0 %vm565_vm0, %v1858_v4  ;;  %1163 = vmatmul.msk.bf16.vlgmr.msra.gmra.mxu1 %vm565_vm0, %v544_v5  ;;  %s2014_s5 = sld [smem:[#allocation22_spill]] }
  0x54   : > { %s2015_s19 = sld [smem:[#allocation33_spill]] }
  0x55   : > { %s2016_s23 = sld [smem:[#allocation34_spill]] }
  0x59   : > { %s1182_s17 = sshll.u32 %s2014_s5, 2 }
  0xd0   : > { %v578_v8 = vpop.f32.mrf.mxu0  ;;  %v614_v9 = vpop.f32.mrf.mxu1 }
  0xd1   : > { %v579_v10 = vadd.f32 %v1308_v6, %v578_v8  ;;  %v615_v11 = vadd.f32 %v1309_v7, %v614_v9 }
  0xd3   : > { %v632_v12 = vpack.c.bf16 %v579_v10, %v579_v10  ;;  %v1869_v13 = vpack.c.bf16 %v615_v11, %v615_v11 }
  0xd5   : > { %667 = vrot.lane.b32.xlu1 %v1869_v13, %s1615_s26  ;;  %693 = vrot.lane.b32.xlu2 %v632_v12, %s1616_s16  ;;  %v639_v14 = vsel %vm634_vm1, %v1869_v13, 0  ;;  %s2017_s26 = sld [smem:[#allocation35_spill]] }
  0xd6   : > { %648 = vmatpush.bf16.xpose.msra.mxu2 %v639_v14 }
  0xd8   : > { %v580_v15 = vpop.f32.mrf.mxu0  ;;  %v616_v16 = vpop.f32.mrf.mxu1 }
  0xdd   : > { %695 = vrot.lane.b32.xlu1 %v1869_v13, %s1616_s16  ;;  %758 = vrot.lane.b32.xlu2 %v1869_v13, %s1617_s14  ;;  %s975_s16 = scalar_lea.hbm %s2017_s26, %s1182_s17 }
  0xde   : > { %1164 = vmatmul.msk.bf16.vlgmr.msra.gmra.mxu2 %vm634_vm1, %v632_v12 }
  0xe5   : > { %756 = vrot.lane.b32.xlu1 %v632_v12, %s1617_s14  ;;  %819 = vrot.lane.b32.xlu2 %v632_v12, %s1618_s12 }
 0x12f   : > { %v694_v17 = vpop.permute.xlu2 %693 }
 0x137   : > { %v759_v18 = vpop.permute.xlu2 %758 }
 0x138   : > { %v764_v19 = vsel %vm634_vm1, %v759_v18, 0 }
 0x139   : > { %773 = vmatpush.bf16.xpose.msrb.mxu1 %v764_v19 }
 0x13f   : > { %v820_v45 = vpop.permute.xlu2 %819 }
 0x147   : > { %v668_v20 = vpop.permute.xlu1 %667 }
 0x148   : > { %v674_v21 = vsel %vm672_vm2, %v668_v20, 0 }
 0x149   : > { %683 = vmatpush.bf16.msra.mxu3 %v674_v21 }
 0x14f   : > { %v696_v22 = vpop.permute.xlu1 %695 }
 0x150   : > { %v701_v23 = vsel %vm634_vm1, %v696_v22, 0 }
 0x151   : > { %710 = vmatpush.bf16.xpose.msrb.mxu3 %v701_v23 }
 0x157   : > { %v757_v27 = vpop.permute.xlu1 %756 }
 0x158   : > { %1168 = vmatmul.msk.bf16.vlgmr.msrb.gmra.mxu1 %vm634_vm1, %v757_v27 }
 0x161   : > { %v650_v32 = vpop.f32.mrf.mxu2 }
 0x162   : > { %v651_v33 = vadd.f32 %v650_v32, %v631_v31 }
 0x164   : > { %v654_v34 = vsel %vm634_vm1, %v651_v33, -inf }
 0x165   : > { %655 = vmax.xlane.f32.xlu0 %v654_v34 }
 0x169   : > { %v652_v35 = vpop.f32.mrf.mxu2 }
 0x1d5   : > { %v775_v36 = vpop.f32.mrf.mxu1 }
 0x1d6   : > { %v776_v37 = vadd.f32 %v775_v36, %v631_v31 }
 0x1d8   : > { %v656_v38 = vpop.xlane.xlu0 %655  ;;  %v779_v39 = vsel %vm634_vm1, %v776_v37, -inf }
 0x1d9   : > { %v657_v40 = vsub.f32 %v651_v33, %v656_v38  ;;  %780 = vmax.xlane.f32.xlu2 %v779_v39 }
 0x1db   : > { %v658_v41 = vmul.f32 1.442695, %v657_v40 }
 0x1dd   : > { %1314 = vpow2.f32 %v658_v41  ;;  %v777_v42 = vpop.f32.mrf.mxu1 }
 0x1de   : > { %v1190_v42 = vld [vmem:[#allocation12 + $0x8] sm:$0xff] }
 0x1df   : > { %912 = vmatpush.bf16.msra.mxu1 %v1190_v42 }
 0x1e3   : > { %v1315_v43 = vpop.eup %1314 }
 0x1e4   : > { %v660_v44 = vsel %vm634_vm1, %v1315_v43, 0.0 }
 0x1e5   : > { %661 = vadd.xlane.f32.xlu0 %v660_v44 }
 0x1f9   : > { %821 = vrot.lane.b32.xlu0 %v1869_v13, %s1618_s12  ;;  %s541_s12 = scalar_lea.vmem [#allocation14], %s1835_s3  ;;  %s1534_s3 = scalar_lea.hbm %s2017_s26, 8 }
 0x24c   : > { %v781_v46 = vpop.xlane.xlu2 %780 }
 0x24d   : > { %v782_v47 = vsub.f32 %v776_v37, %v781_v46 }
 0x24f   : > { %v783_v48 = vmul.f32 1.442695, %v782_v47 }
 0x251   : > { %1316 = vpow2.f32 %v783_v48  ;;  %v1311_v48 = vld [vmem:[%s2013_s10] ss:$0 sm:$0xff] }
 0x257   : > { %v1317_v49 = vpop.eup %1316 }
 0x258   : > { %v662_v50 = vpop.xlane.xlu0 %661  ;;  %v785_v51 = vsel %vm634_vm1, %v1317_v49, 0.0 }
 0x259   : > { %1318 = vrcp.f32 %v662_v50  ;;  %786 = vadd.xlane.f32.xlu2 %v785_v51 }
 0x25f   : > { %v1319_v52 = vpop.eup %1318 }
 0x260   : > { %v664_v53 = vmul.f32 %v1319_v52, %v1315_v43  ;;  %v1189_v43 = vld [vmem:[#allocation12] sm:$0xff] }
 0x261   : > { %913 = vmatpush.bf16.msra.mxu1 %v1189_v43 }
 0x262   : > { %v665_v54 = vpack.c.bf16 %v664_v53, %v664_v53 }
 0x264   : > { %1165 = vmatmul.msk.bf16.vlgmr.msra.gmra.mxu3 %vm634_vm1, %v665_v54 }
 0x26b   : > { %v822_v55 = vpop.permute.xlu0 %821 }
 0x26c   : > { %v827_v56 = vsel %vm634_vm1, %v822_v55, 0  ;;  %v1626_v55 = vmov 32.0  }
 0x26d   : > { %836 = vmatpush.bf16.xpose.msra.mxu3 %v827_v56 }
 0x274   : > { %1166 = vmatmul.msk.bf16.vlgmr.msrb.gmra.mxu3 %vm634_vm1, %v694_v17 }
 0x284   : > { %1170 = vmatmul.msk.bf16.vlgmr.msra.gmra.mxu3 %vm634_vm1, %v820_v45 }
 0x2cc   : > { %v787_v18 = vpop.xlane.xlu2 %786 }
 0x2e7   : > { %v685_v57 = vpop.f32.mrf.mxu3 }
 0x2e8   : > { %v689_v58 = vpack.c.bf16 %v685_v57, %v685_v57 }
 0x2ea   : > { %691 = vst.msk [vmem:[#allocation2] sm:$0xf] %vm690_vm4, %v689_v58 }
 0x2ef   : > { %v687_v59 = vpop.f32.mrf.mxu3 }
 0x2f7   : > { %v712_v60 = vpop.f32.mrf.mxu3 }
 0x2f8   : > { %v713_v61 = vadd.f32 %v712_v60, %v631_v31 }
 0x2fa   : > { %v716_v62 = vsel %vm634_vm1, %v713_v61, -inf }
 0x2fb   : > { %717 = vmax.xlane.f32.xlu1 %v716_v62 }
 0x2ff   : > { %v714_v63 = vpop.f32.mrf.mxu3 }
 0x307   : > { %v838_v0 = vpop.f32.mrf.mxu3 }
 0x308   : > { %v839_v1 = vadd.f32 %v838_v0, %v631_v31 }
 0x30a   : > { %v842_v2 = vsel %vm634_vm1, %v839_v1, -inf }
 0x30b   : > { %843 = vmax.xlane.f32.xlu0 %v842_v2 }
 0x30f   : > { %v840_v3 = vpop.f32.mrf.mxu3 }
 0x314   : > { %728 = vrot.lane.b32.xlu1 %v1869_v13, %s1620_s22  ;;  %s977_s22 = sshll.u32 %s541_s12, 4  ;;  %s978_s22 = int_to_ptr.vmem [resolvable:$true] %s977_s22 }
 0x36e   : > { %v718_v5 = vpop.xlane.xlu1 %717 }
 0x36f   : > { %v719_v6 = vsub.f32 %v713_v61, %v718_v5 }
 0x371   : > { %v720_v7 = vmul.f32 1.442695, %v719_v6 }
 0x373   : > { %1320 = vpow2.f32 %v720_v7 }
 0x379   : > { %v1321_v8 = vpop.eup %1320 }
 0x37a   : > { %v722_v9 = vsel %vm634_vm1, %v1321_v8, 0.0 }
 0x37b   : > { %723 = vadd.xlane.f32.xlu2 %v722_v9 }
 0x37e   : > { %v844_v10 = vpop.xlane.xlu0 %843 }
 0x37f   : > { %v845_v11 = vsub.f32 %v839_v1, %v844_v10 }
 0x381   : > { %v846_v12 = vmul.f32 1.442695, %v845_v11 }
 0x383   : > { %1322 = vpow2.f32 %v846_v12  ;;  %v1312_v12 = vld [vmem:[%s2015_s19] ss:$0 sm:$0xff] }
 0x384   : > { %1324 = vrcp.f32 %v787_v18 }
 0x386   : > { %v729_v14 = vpop.permute.xlu1 %728 }
 0x387   : > { %v734_v15 = vsel %vm672_vm2, %v729_v14, 0 }
 0x388   : > { %743 = vmatpush.bf16.msrb.mxu0 %v734_v15  ;;  %v1313_v15 = vld [vmem:[%s2016_s23] ss:$0 sm:$0xff] }
 0x389   : > { %v1323_v16 = vpop.eup %1322 }
 0x38a   : > { %v848_v17 = vsel %vm634_vm1, %v1323_v16, 0.0  ;;  %v1325_v20 = vpop.eup %1324 }
 0x38b   : > { %849 = vadd.xlane.f32.xlu0 %v848_v17  ;;  %v789_v22 = vmul.f32 %v1325_v20, %v1317_v49  ;;  %v919_v49 = vunpack.c.l.bf16 %v1858_v4 }
 0x38d   : > { %v790_v27 = vpack.c.bf16 %v789_v22, %v789_v22 }
 0x393   : > { %791 = vrot.lane.b32.xlu2 %v1869_v13, %s1621_s28  ;;  %s979_s28 = sshll.u32 %s975_s16, 4  ;;  %s980_s28 = int_to_ptr.hbm [resolvable:$true] %s979_s28 }
 0x39f   : > { %854 = vrot.lane.b32.xlu0 %v1869_v13, %s1622_s24  ;;  %s964_s24 = scalar_lea.sflag [#allocation5], %s1832_s1 }
 0x3ee   : > { %v724_v19 = vpop.xlane.xlu2 %723 }
 0x3ef   : > { %1326 = vrcp.f32 %v724_v19 }
 0x3f5   : > { %v1327_v21 = vpop.eup %1326 }
 0x3f6   : > { %v726_v23 = vmul.f32 %v1327_v21, %v1321_v8  ;;  %v792_v24 = vpop.permute.xlu2 %791 }
 0x3f7   : > { %v797_v25 = vsel %vm672_vm2, %v792_v24, 0 }
 0x3f8   : > { %806 = vmatpush.bf16.msrb.mxu2 %v797_v25  ;;  %v727_v26 = vpack.c.bf16 %v726_v23, %v726_v23 }
 0x3fa   : > { %1167 = vmatmul.msk.bf16.vlgmr.msrb.gmra.mxu0 %vm634_vm1, %v727_v26 }
 0x3fb   : > { %1169 = vmatmul.msk.bf16.vlgmr.msrb.gmra.mxu2 %vm634_vm1, %v790_v27 }
 0x3fe   : > { %v850_v28 = vpop.xlane.xlu0 %849 }
 0x3ff   : > { %1328 = vrcp.f32 %v850_v28 }
 0x400   : > { %1330 = vrcp.f32 %v1626_v55 }
 0x405   : > { %v1329_v13 = vpop.eup %1328 }
 0x406   : > { %v852_v29 = vmul.f32 %v1329_v13, %v1323_v16  ;;  %v1331_v56 = vpop.eup %1330 }
 0x407   : > { %v927_v57 = vmul.f32 32.0, %v1331_v56  ;;  %vm931_vm8 = vweird.f32 %v1331_v56 }
 0x408   : > { %v853_v32 = vpack.c.bf16 %v852_v29, %v852_v29 }
 0x409   : > { %v928_v58 = vsub.f32 1.0, %v927_v57 }
 0x40b   : > { %v929_v59 = vmul.f32 %v1331_v56, %v928_v58 }
 0x40d   : > { %v930_v60 = vadd.f32 %v1331_v56, %v929_v59 }
 0x40f   : > { %v932_v61 = vsel %vm931_vm8, %v1331_v56, %v930_v60 }
 0x411   : > { %v855_v30 = vpop.permute.xlu0 %854 }
 0x412   : > { %v860_v31 = vsel %vm672_vm2, %v855_v30, 0 }
 0x413   : > { %869 = vmatpush.bf16.msra.mxu0 %v860_v31 }
 0x416   : > { %1171 = vmatmul.msk.bf16.vlgmr.msra.gmra.mxu0 %vm634_vm1, %v853_v32 }
 0x477   : > { %v745_v33 = vpop.f32.mrf.mxu0 }
 0x478   : > { %v749_v34 = vpack.c.bf16 %v745_v33, %v745_v33 }
 0x47a   : > { %751 = vrot.lane.b32.xlu1 %v749_v34, %s1623_s29  ;;  %s1528_s29 = sshra.s32 %s980_s28, 4  ;;  %s1529_s29 = int_to_ptr.hbm [resolvable:$true] %s1528_s29 }
 0x47b   : > { %p1535_p6 = scmp.lt.s32.totalorder %s1529_s29, %s2017_s26 }
 0x47e   : > { %v808_v35 = vpop.f32.mrf.mxu2 }
 0x47f   : > { %v812_v36 = vpack.c.bf16 %v808_v35, %v808_v35  ;;  %v747_v37 = vpop.f32.mrf.mxu0 }
 0x482   : > { %814 = vrot.lane.b32.xlu1 %v812_v36, %s1624_s11  ;;  %s1530_s11 = scalar_lea.hbm %s1529_s29, 4 }
 0x483   : > { %p1531_p1 = scmp.ne.s32.totalorder %s1529_s29, %s1530_s11  ;;  %p1536_p8 = scmp.lt.s32.totalorder %s1534_s3, %s1530_s11 }
 0x485   : > { %p1532_p3 = pnand %p1531_p1, %p1767_p4  ;;  %p1537_p10 = por %p1536_p8, %p1535_p6 }
 0x486   : > { %v810_v38 = vpop.f32.mrf.mxu2 }
 0x487   : > { %p1533_p5 = pneg %p1532_p3 }
 0x489   : > { %p1538_p11 = pnand %p1537_p10, %p1533_p5 }
 0x493   : > { %v871_v39 = vpop.f32.mrf.mxu0 }
 0x494   : > { %v875_v40 = vpack.c.bf16 %v871_v39, %v871_v39 }
 0x496   : > { %877 = vrot.lane.b32.xlu2 %v875_v40, %s1625_s9 }
 0x49b   : > { %v873_v41 = vpop.f32.mrf.mxu0 }
 0x4ec   : > { %v752_v44 = vpop.permute.xlu1 %751 }
 0x4ed   : > { %755 = vst.msk [vmem:[#allocation2] sm:$0xf] %vm754_vm5, %v752_v44 }
 0x4f0   : > { %v878_v46 = vpop.permute.xlu2 %877 }
 0x4f4   : > { %v815_v45 = vpop.permute.xlu1 %814 }
 0x4f5   : > { %818 = vst.msk [vmem:[#allocation2] sm:$0xf] %vm817_vm6, %v815_v45 }
 0x4f6   : > { %881 = vst.msk [vmem:[#allocation2] sm:$0xf] %vm880_vm7, %v878_v46 }
 0x4fd   : > { %v882_v47 = vld [vmem:[#allocation2] sm:$0xf] }
 0x4fe   : > { %1180 = vmatmul.msk.bf16.vlgmr.msra.gmra.mxu1 %vm565_vm0, %v882_v47 }
 0x57b   : > { %v915_v50 = vpop.f32.mrf.mxu1 }
 0x57c   : > { %v916_v51 = vadd.f32 %v1311_v48, %v915_v50 }
 0x57e   : > { %v920_v52 = vadd.f32 %v919_v49, %v916_v51 }
 0x580   : > { %v923_v53 = vsel %vm565_vm0, %v920_v52, 0.0 }
 0x581   : > { %924 = vadd.xlane.f32.xlu0 %v923_v53 }
 0x583   : > { %v917_v54 = vpop.f32.mrf.mxu1 }
 0x5f4   : > { %v925_v62 = vpop.xlane.xlu0 %924 }
 0x5f5   : > { %v933_v63 = vmul.f32 %v932_v61, %v925_v62 }
 0x5f7   : > { %v934_v0 = vsub.f32 %v920_v52, %v933_v63 }
 0x5f9   : > { %v935_v4 = vmul.f32 %v934_v0, %v934_v0 }
 0x5fb   : > { %v936_v1 = vsel %vm565_vm0, %v935_v4, 0.0 }
 0x5fc   : > { %937 = vadd.xlane.f32.xlu1 %v936_v1 }
 0x66f   : > { %v938_v2 = vpop.xlane.xlu1 %937 }
 0x670   : > { %v939_v3 = vmul.f32 %v938_v2, %v932_v61 }
 0x672   : > { %v940_v5 = vadd.f32 1e-05, %v939_v3 }
 0x674   : > { %1332 = vrsqrt.f32 %v940_v5  ;;  %vm947_vm10 = vweird.f32 %v940_v5 }
 0x67a   : > { %v1333_v6 = vpop.eup %1332 }
 0x67b   : > { %v942_v7 = vmul.f32 %v1333_v6, %v940_v5  ;;  %vm948_vm9 = vweird.f32 %v1333_v6 }
 0x67c   : > { %vm949_vm11 = vmor %vm947_vm10, %vm948_vm9 }
 0x67d   : > { %v943_v8 = vmul.f32 %v1333_v6, %v942_v7 }
 0x67f   : > { %v944_v9 = vmul.f32 0.5, %v943_v8 }
 0x681   : > { %v945_v10 = vsub.f32 1.5, %v944_v9 }
 0x683   : > { %v946_v11 = vmul.f32 %v1333_v6, %v945_v10 }
 0x685   : > { %v950_v14 = vsel %vm949_vm11, %v1333_v6, %v946_v11 }
 0x686   : > { %v951_v16 = vmul.f32 %v950_v14, %v934_v0 }
 0x688   : > { %v955_v17 = vmul.f32 %v1312_v12, %v951_v16 }
 0x68a   : > { %v959_v18 = vadd.f32 %v1313_v15, %v955_v17 }
 0x68c   : > { %v960_v19 = vpack.c.bf16 %v959_v18, %v959_v18 }
 0x68e   : > { %962 = vst.msk [vmem:[%s541_s12] sm:$0xf] %vm961_vm12, %v960_v19 }
 0x68f   : > { %1541 = shalt.err (!%p1538_p11)
}
 0x690   : > { %1209 = dma.vmem_to_hbm [thread:$0]  (%p1767_p4), %s978_s22, 64, %s980_s28, %s964_s24  }
 0x691 PF: > { %s2019_s1 = sld [smem:[#allocation20_spill]] }
 0x692   : > { %s2021_s17 = sld [smem:[#allocation23_spill]] }
 0x697   : > { %s991_s7 = sand.u32 1, %s2019_s1  }
 0x698   : > { %p2022_p12 = scmp.ge.s32.totalorder %s2021_s17, 2  ;;  %s992_s8 = scalar_lea.sflag [#allocation5], %s991_s7 }
 0x69a   : > { %p1232_p13 = pnand %p2022_p12, %p1775_p9 }
 0x69c   : > { %p1233_p0 = pneg %p1232_p13 }
 0x69e   : > { %1583 = dma.done.wait (%p1233_p0), %s992_s8, 64  }
 0x69f   : > { %1585 = vsyncadd (%p1233_p0), %s992_s8, 4294967232  ;;  %s32_s22 = sadd.s32 1, %s2021_s17   ;;  %s2023_s19 = sld [smem:[#allocation21_spill]] }
 0x6a0   : > { %p29_p2 = scmp.ge.s32.totalorder %s32_s22, 4   ;;  %s2024_s20 = sld [smem:[#allocation26_spill]] }
 0x6a1   : > { %s2025_s27 = sld [smem:[#allocation24_spill]]  ;;  %s2026_s17 = smov %s1592_s18 }
 0x6a3   :  { %31 = sbr.rel (!%p29_p2) target bundleno = 19 (0x13), region = 145 }
 0x6a5   : > { %s2027_s18 = smov %s2023_s19 }
 0x6a6   : > { %s2028_s19 = smov %s2024_s20  ;;  %s2029_s20 = smov %s1604_s21 }
 0x6a7   : > { %s2030_s21 = smov %s2025_s27 }
 0x6a8   :  { %998 = vsyncpa [#allocation4], 1 }
 0x6a9   :  { %1000 = vsyncpa [#allocation4 + $0x1], 1 }
 0x6aa   :  { %1001 = vsyncpa [#allocation7], 1 }
 0x6ab   :  { %1003 = vsyncpa [#allocation7 + $0x1], 1 }
 0x6ac   :  { %1004 = vsyncpa [#allocation10], 1 }
 0x6ad   :  { %1005 = vsyncpa [#allocation13], 1 }
 0x6ae   :  { %1006 = vsyncpa [#allocation5], 1 }
 0x6af   :  { %1008 = vsyncpa [#allocation5 + $0x1], 1 }

</bundles_post_ra>
